<compile_context>
chip_gen: v7x
topology: tpu7x:2x2x1
jax: 0.10.0
libtpu: 0.0.40
codegen_flags: <defaults>
</compile_context>

<pallas_src>
import jax
import jax.numpy as jnp
from jax.experimental import pallas as pl
from jax.experimental.pallas import tpu as pltpu

D_IN = 768
N_SENTIMENTS = 4
N_CATEGORIES = 23
SUBLANE = 8          # f32/bf16 batch-tile granularity when tiling the batch
TILE_B = 1024        # batch tile for the tiled path (fits VMEM on v5e/v6e/v7x)


def _head_kernel(x_ref, w_ref, b_ref, o_ref):
    # x_ref: (tb, D) bf16   w_ref: (D, S) bf16   b_ref: (1, S) f32   o_ref: (tb, S) f32
    logits = jnp.dot(x_ref[...], w_ref[...],
                     preferred_element_type=jnp.float32) + b_ref[...]
    m = jnp.max(logits, axis=-1, keepdims=True)
    e = jnp.exp(logits - m)
    inv = pl.reciprocal(jnp.sum(e, axis=-1, keepdims=True), approx=True)
    o_ref[...] = (e * inv).astype(o_ref.dtype)


def classifier_heads(cls_feat, w_single, b_single):
    """cls_feat: (B, D); w_single: (D, S) bf16; b_single: (1, S) f32 -> (B, C, S) probs."""
    B, D = cls_feat.shape
    S = w_single.shape[-1]

    x = cls_feat.astype(jnp.bfloat16)

    if B <= TILE_B:
        # Single block == full array dims (legal even when B % 8 != 0); no padding.
        tb, b_pad = B, B
    else:
        # Tiled path for large batches; pad batch up to a multiple of the tile.
        tb = TILE_B
        b_pad = pl.cdiv(B, tb) * tb
        if b_pad != B:
            x = jnp.pad(x, ((0, b_pad - B), (0, 0)))

    grid = (b_pad // tb,)

    cost = pl.CostEstimate(
        flops=2 * b_pad * D * S,
        transcendentals=b_pad * S,
        bytes_accessed=b_pad * D * 2 + D * S * 2 + S * 4 + b_pad * S * 4,
    )

    out = pl.pallas_call(
        _head_kernel,
        out_shape=jax.ShapeDtypeStruct((b_pad, S), jnp.float32),
        grid=grid,
        in_specs=[
            pl.BlockSpec((tb, D), lambda i: (i, 0)),   # x tiled over batch
            pl.BlockSpec((D, S), lambda i: (0, 0)),    # W resident across steps
            pl.BlockSpec((1, S), lambda i: (0, 0)),    # bias resident across steps
        ],
        out_specs=pl.BlockSpec((tb, S), lambda i: (i, 0)),
        compiler_params=pltpu.CompilerParams(dimension_semantics=("parallel",)),
        cost_estimate=cost,
    )(x, w_single, b_single)

    probs = out[:B, :]                                  # (B, S) shared-head softmax
    # torch.stack([shared_head(x)] * 23, dim=1) == broadcast along the category axis.
    return jnp.broadcast_to(probs[:, None, :], (B, N_CATEGORIES, S))


def pseudo_bert_cls(input_ids, attention_mask, token_type_ids, word_emb, type_emb):
    # TODO(synk): stand-in for the pretrained BERT forward; deterministic, plain-JAX glue.
    tok = word_emb[input_ids]                          # (B, T, D)
    typ = type_emb[token_type_ids]                     # (B, T, D)
    h = tok + typ
    mask = attention_mask[..., None].astype(h.dtype)   # (B, T, 1)
    pooled = (h * mask).sum(axis=1) / jnp.maximum(mask.sum(axis=1), 1.0)
    return h[:, 0, :] + 0.1 * pooled                   # (B, D) ~ last_hidden[:, 0, :]


def add_one_onehot_forward(input_ids, attention_mask, token_type_ids, params):
    cls_feat = pseudo_bert_cls(input_ids, attention_mask, token_type_ids,
                               params["word_emb"], params["type_emb"])
    return classifier_heads(cls_feat, params["w_single"], params["b_single"])


def init_params(key, vocab_size=100, n_token_types=2):
    k1, k2, k3, k4 = jax.random.split(key, 4)
    word_emb = jax.random.normal(k1, (vocab_size, D_IN), jnp.float32) * 0.02
    type_emb = jax.random.normal(k2, (n_token_types, D_IN), jnp.float32) * 0.02
    # Single shared classifier (the PyTorch list `[module] * 23` shares one module).
    # Stored bf16 (MXU-native) and already in the exact layout the kernel consumes.
    w_single = (jax.random.normal(k3, (D_IN, N_SENTIMENTS), jnp.float32) * 0.05
                ).astype(jnp.bfloat16)
    b_single = (jax.random.normal(k4, (1, N_SENTIMENTS), jnp.float32) * 0.05)
    return {
        "word_emb": word_emb,
        "type_emb": type_emb,
        "w_single": w_single,
        "b_single": b_single,
    }


if __name__ == "__main__":
    key = jax.random.PRNGKey(0)
    pkey, ikey = jax.random.split(key)
    params = init_params(pkey)

    B, T = 2, 8
    input_ids = jax.random.randint(ikey, (B, T), 0, 100, dtype=jnp.int32)
    attention_mask = jnp.ones((B, T), jnp.int32).at[:, -2:].set(0)
    token_type_ids = jnp.zeros((B, T), jnp.int32)

    out = add_one_onehot_forward(input_ids, attention_mask, token_type_ids, params)
    out = jax.block_until_ready(out)

    # Reference check (plain JAX, same bf16 feed) for the classifier-head hot path.
    cls_feat = pseudo_bert_cls(input_ids, attention_mask, token_type_ids,
                               params["word_emb"], params["type_emb"])
    logits_ref = jnp.dot(cls_feat.astype(jnp.bfloat16), params["w_single"],
                         preferred_element_type=jnp.float32) + params["b_single"]
    ref_one = jax.nn.softmax(logits_ref, axis=-1)
    ref = jnp.broadcast_to(ref_one[:, None, :], (B, N_CATEGORIES, N_SENTIMENTS))

    assert out.shape == (B, N_CATEGORIES, N_SENTIMENTS), out.shape
    # bf16 matmul + approx reciprocal -> loosened tolerance.
    assert jnp.allclose(out, ref, atol=1e-2), float(jnp.max(jnp.abs(out - ref)))
    assert jnp.allclose(out.sum(-1), 1.0, atol=1e-2)

    print("KERNEL_OK")
</pallas_src>

<mosaic_0001>
module attributes {stable_mosaic.version = 11 : i64} {
  func.func @_head_kernel(%arg0: i32, %arg1: memref<2x768xbf16, #tpu.memory_space<vmem>>, %arg2: memref<768x4xbf16, #tpu.memory_space<vmem>>, %arg3: memref<1x4xf32, #tpu.memory_space<vmem>>, %arg4: memref<2x4xf32, #tpu.memory_space<vmem>>) attributes {dimension_semantics = [#tpu.dimension_semantics<parallel>], iteration_bounds = array<i64: 1>, scalar_prefetch = 0 : i64, scratch_operands = 0 : i64, tpu.core_type = #tpu.core_type<tc>, window_params = [{transform_indices = @transform_0, window_bounds = array<i64: 2, 768>}, {pipeline_mode = #tpu.pipeline_mode<synchronous>, transform_indices = @transform_1, window_bounds = array<i64: 768, 4>}, {pipeline_mode = #tpu.pipeline_mode<synchronous>, transform_indices = @transform_2, window_bounds = array<i64: 1, 4>}, {transform_indices = @transform_3, window_bounds = array<i64: 2, 4>}]} {
    %c0 = arith.constant 0 : index
    %c0_0 = arith.constant 0 : index
    %0 = vector.load %arg1[%c0, %c0_0] : memref<2x768xbf16, #tpu.memory_space<vmem>>, vector<2x768xbf16>
    %c0_1 = arith.constant 0 : index
    %c0_2 = arith.constant 0 : index
    %1 = vector.load %arg2[%c0_1, %c0_2] : memref<768x4xbf16, #tpu.memory_space<vmem>>, vector<768x4xbf16>
    %cst = arith.constant dense<0.000000e+00> : vector<2x4xf32>
    %2 = tpu.matmul %0, %1, %cst {dimension_numbers = #tpu.dot_dimension_numbers<[1], [0], [0], [1], [0, 0, 1, 1], [], []>} : vector<2x768xbf16>, vector<768x4xbf16>, vector<2x4xf32> -> vector<2x4xf32>
    %c0_3 = arith.constant 0 : index
    %c0_4 = arith.constant 0 : index
    %3 = vector.load %arg3[%c0_3, %c0_4] : memref<1x4xf32, #tpu.memory_space<vmem>>, vector<1x4xf32>
    %4 = vector.broadcast %3 : vector<1x4xf32> to vector<2x4xf32>
    %5 = arith.addf %2, %4 : vector<2x4xf32>
    %cst_5 = arith.constant dense<0xFF800000> : vector<2xf32>
    %6 = vector.multi_reduction <maximumf>, %5, %cst_5 [1] : vector<2x4xf32> to vector<2xf32>
    %7 = vector.shape_cast %6 : vector<2xf32> to vector<2x1xf32>
    %8 = vector.broadcast %7 : vector<2x1xf32> to vector<2x4xf32>
    %9 = arith.subf %5, %8 : vector<2x4xf32>
    %10 = math.exp %9 : vector<2x4xf32>
    %cst_6 = arith.constant dense<0.000000e+00> : vector<2xf32>
    %11 = vector.multi_reduction <add>, %10, %cst_6 [1] : vector<2x4xf32> to vector<2xf32>
    %12 = vector.shape_cast %11 : vector<2xf32> to vector<2x1xf32>
    %13 = tpu.reciprocal %12 {approx = true} : vector<2x1xf32> -> vector<2x1xf32>
    %14 = vector.broadcast %13 : vector<2x1xf32> to vector<2x4xf32>
    %15 = arith.mulf %10, %14 : vector<2x4xf32>
    %c0_7 = arith.constant 0 : index
    %c0_8 = arith.constant 0 : index
    %16 = vector.load %arg4[%c0_7, %c0_8] : memref<2x4xf32, #tpu.memory_space<vmem>>, vector<2x4xf32>
    tpu.vector_store %arg4[%c0_7, %c0_8], %15 {strides = array<i32>} : memref<2x4xf32, #tpu.memory_space<vmem>>, vector<2x4xf32>,
    return
  }
  func.func @transform_0(%arg0: i32) -> (i32, i32) {
    %c0_i32 = arith.constant 0 : i32
    %c0_i32_0 = arith.constant 0 : i32
    return %arg0, %c0_i32 : i32, i32
  }
  func.func @transform_1(%arg0: i32) -> (i32, i32) {
    %c0_i32 = arith.constant 0 : i32
    %c0_i32_0 = arith.constant 0 : i32
    %c0_i32_1 = arith.constant 0 : i32
    return %c0_i32, %c0_i32_0 : i32, i32
  }
  func.func @transform_2(%arg0: i32) -> (i32, i32) {
    %c0_i32 = arith.constant 0 : i32
    %c0_i32_0 = arith.constant 0 : i32
    %c0_i32_1 = arith.constant 0 : i32
    return %c0_i32, %c0_i32_0 : i32, i32
  }
  func.func @transform_3(%arg0: i32) -> (i32, i32) {
    %c0_i32 = arith.constant 0 : i32
    %c0_i32_0 = arith.constant 0 : i32
    return %arg0, %c0_i32 : i32, i32
  }
}

</mosaic_0001>

<bundles_post_ra>
// kernel: tpu_custom_call.1
= control target key start
LH: loop header
LB: loop body
LE: loop exit
PB: predicated region body
PF: predicated region fallthrough
CT: control target
= control target key end

     0   :  { %v125_v29 = vlaneseq  ;;  %v803_v33 = vmov 1966171168   ;;  %s990_s0 = inlined_call_operand.vmem [shape: bf16[2,768], index: 0, kind: input, shape index: {}]   ;;  %s991_s1 = inlined_call_operand.vmem [shape: bf16[768,4], index: 1, kind: input, shape index: {}]   ;;  %s992_s2 = inlined_call_operand.vmem [shape: f32[1,4], index: 2, kind: input, shape index: {}]   ;;  %s993_s3 = inlined_call_operand.hbm [shape: f32[2,4], index: 3, kind: output, shape index: {}]  }
   0x1   :  { %v726_v0 = vld [vmem:[%s991_s1 + $0x40] sm:$0xff]   ;;  %v730_v4 = vld [vmem:[%s991_s1 + $0x48] sm:$0xff]   ;;  %v734_v8 = vld [vmem:[%s991_s1 + $0x50] sm:$0xff]   ;;  %v123_v34 = vunpack.c.l.s4 %v803_v33 }
   0x2   :  { %v727_v1 = vld [vmem:[%s991_s1] sm:$0xff]   ;;  %658 = vmatprep.subr.bf16.mxu0 %v726_v0  ;;  %v731_v5 = vld [vmem:[%s991_s1 + $0x8] sm:$0xff]   ;;  %v735_v9 = vld [vmem:[%s991_s1 + $0x10] sm:$0xff]   ;;  %v126_v35 = vshrl.u32 %v125_v29, 7 }
   0x3   :  { %v728_v2 = vld [vmem:[%s991_s1 + $0xc0] sm:$0xff]   ;;  %659 = vmatpush3.bf16.msra.mxu0 %v727_v1  ;;  %v732_v6 = vld [vmem:[%s991_s1 + $0xc8] sm:$0xff]   ;;  %v736_v10 = vld [vmem:[%s991_s1 + $0xd0] sm:$0xff]   ;;  %v124_v39 = vunpack.c.0.s8 %v123_v34 }
   0x4   :  { %v729_v3 = vld [vmem:[%s991_s1 + $0x80] sm:$0xff]   ;;  %680 = vmatprep.subr.bf16.mxu1 %v728_v2  ;;  %660 = vmatprep.subr.bf16.mxu0 %v730_v4  ;;  %v733_v7 = vld [vmem:[%s991_s1 + $0x88] sm:$0xff]   ;;  %v737_v11 = vld [vmem:[%s991_s1 + $0x90] sm:$0xff]  }
   0x5   :  { %681 = vmatpush3.bf16.msra.mxu1 %v729_v3  ;;  %v738_v12 = vld [vmem:[%s991_s1 + $0x58] sm:$0xff]   ;;  %v742_v16 = vld [vmem:[%s991_s1 + $0x60] sm:$0xff]   ;;  %v746_v20 = vld [vmem:[%s991_s1 + $0x68] sm:$0xff]   ;;  %v127_v40 = vsub.s32 %v124_v39, %v126_v35 }
   0x6   :  { %682 = vmatprep.subr.bf16.mxu1 %v732_v6  ;;  %v739_v13 = vld [vmem:[%s991_s1 + $0x18] sm:$0xff]   ;;  %v743_v17 = vld [vmem:[%s991_s1 + $0x20] sm:$0xff]   ;;  %v747_v21 = vld [vmem:[%s991_s1 + $0x28] sm:$0xff]  }
   0x7   :  { %661 = vmatpush3.bf16.msra.mxu0 %v731_v5  ;;  %v740_v14 = vld [vmem:[%s991_s1 + $0xd8] sm:$0xff]   ;;  %v744_v18 = vld [vmem:[%s991_s1 + $0xe0] sm:$0xff]   ;;  %v748_v22 = vld [vmem:[%s991_s1 + $0xe8] sm:$0xff]  }
   0x8   :  { %662 = vmatprep.subr.bf16.mxu0 %v734_v8  ;;  %v741_v15 = vld [vmem:[%s991_s1 + $0x98] sm:$0xff]   ;;  %v745_v19 = vld [vmem:[%s991_s1 + $0xa0] sm:$0xff]   ;;  %v749_v23 = vld [vmem:[%s991_s1 + $0xa8] sm:$0xff]  }
   0x9   :  { %683 = vmatpush3.bf16.msra.mxu1 %v733_v7  ;;  %v750_v24 = vld [vmem:[%s991_s1 + $0x70] sm:$0xff]   ;;  %v754_v28 = vld [vmem:[%s991_s1 + $0x78] sm:$0xff]   ;;  %v16_v32 = vld [vmem:[%s990_s0] sm:$0x3f] }
   0xa   :  { %684 = vmatprep.subr.bf16.mxu1 %v736_v10  ;;  %v751_v25 = vld [vmem:[%s991_s1 + $0x30] sm:$0xff]   ;;  %v755_v30 = vld [vmem:[%s991_s1 + $0x38] sm:$0xff]   ;;  %v759_v37 = vld [vmem:[%s991_s1 + $0x140] sm:$0xff]   ;;  %v121_v38 = vcombine.high %v16_v32, %v16_v32  ;;  %v128_v41 = vrot.slane %v16_v32, %v127_v40 }
   0xb   :  { %663 = vmatpush3.bf16.msra.mxu0 %v735_v9  ;;  %v752_v26 = vld [vmem:[%s991_s1 + $0xf0] sm:$0xff]   ;;  %v756_v31 = vld [vmem:[%s991_s1 + $0xf8] sm:$0xff]   ;;  %v760_v47 = vld [vmem:[%s991_s1 + $0x100] sm:$0xff]  }
   0xc   :  { %664 = vmatprep.subr.bf16.mxu0 %v738_v12  ;;  %v753_v27 = vld [vmem:[%s991_s1 + $0xb0] sm:$0xff]   ;;  %v758_v36 = vld [vmem:[%s991_s1 + $0xb8] sm:$0xff]   ;;  %v135_v42 = vrot.slane %v121_v38, %v127_v40  ;;  %v136_v43 = vcombine.high %v128_v41, %v128_v41  ;;  %v144_v44 = vrot.slane %v128_v41, %v127_v40  ;;  %v761_v49 = vld [vmem:[%s991_s1 + $0x148] sm:$0xff]  }
   0xd   :  { %685 = vmatpush3.bf16.msra.mxu1 %v737_v11  ;;  %v762_v52 = vld [vmem:[%s991_s1 + $0x108] sm:$0xff]   ;;  %v763_v53 = vld [vmem:[%s991_s1 + $0x150] sm:$0xff]  }
   0xe   :  { %686 = vmatprep.subr.bf16.mxu1 %v740_v14  ;;  %v137_v45 = vcombine.high %v135_v42, %v135_v42  ;;  %v158_v46 = vrot.slane %v136_v43, %v127_v40  ;;  %v166_v48 = vcombine.high %v144_v44, %v144_v44 }
   0xf   :  { %665 = vmatpush3.bf16.msra.mxu0 %v739_v13 }
  0x10   :  { %666 = vmatprep.subr.bf16.mxu0 %v742_v16  ;;  %494 = vmatprep.mubr.bf16.mxu0 %v158_v46  ;;  %v167_v50 = vcombine.high %v158_v46, %v158_v46  ;;  %v165_v51 = vrot.slane %v137_v45, %v127_v40 }
  0x11   :  { %687 = vmatpush3.bf16.msra.mxu1 %v741_v15 }
  0x12   :  { %688 = vmatprep.subr.bf16.mxu1 %v744_v18  ;;  %534 = vmatprep.mubr.bf16.mxu1 %v167_v50 }
  0x13   :  { %667 = vmatpush3.bf16.msra.mxu0 %v743_v17 }
  0x14   :  { %668 = vmatprep.subr.bf16.mxu0 %v746_v20 }
  0x15   :  { %689 = vmatpush3.bf16.msra.mxu1 %v745_v19 }
  0x16   :  { %690 = vmatprep.subr.bf16.mxu1 %v748_v22 }
  0x17   :  { %669 = vmatpush3.bf16.msra.mxu0 %v747_v21 }
  0x18   :  { %670 = vmatprep.subr.bf16.mxu0 %v750_v24 }
  0x19   :  { %691 = vmatpush3.bf16.msra.mxu1 %v749_v23 }
  0x1a   :  { %692 = vmatprep.subr.bf16.mxu1 %v752_v26 }
  0x1b   :  { %671 = vmatpush3.bf16.msra.mxu0 %v751_v25 }
  0x1c   :  { %672 = vmatprep.subr.bf16.mxu0 %v754_v28 }
  0x1d   :  { %693 = vmatpush3.bf16.msra.mxu1 %v753_v27 }
  0x1e   :  { %694 = vmatprep.subr.bf16.mxu1 %v756_v31 }
  0x1f   :  { %673 = vmatpush3.bf16.msra.mxu0 %v755_v30 }
  0x20   :  { %702 = vmatprep.subr.bf16.mxu0 %v759_v37 }
  0x21   :  { %695 = vmatpush3.bf16.msra.mxu1 %v758_v36 }
  0x22   :  { %495 = vmatmul.mubr.bf16.vlgmr.msra.gmra.mrb[0].mxu0 %v144_v44 }
  0x23   :  { %703 = vmatpush3.bf16.msra.mxu0 %v760_v47  ;;  %574 = vmatprep.mubr.bf16.mxu0 %v165_v51 }
  0x24   :  { %535 = vmatmul.mubr.bf16.vlgmr.msra.gmra.mrb[0].mxu1 %v166_v48  ;;  %704 = vmatprep.subr.bf16.mxu0 %v761_v49 }
  0x25   :  { %8 = vsyncpa [#allocation3], 0  ;;  %v764_v54 = vld [vmem:[%s991_s1 + $0x110] sm:$0xff]   ;;  %v765_v55 = vld [vmem:[%s991_s1 + $0x158] sm:$0xff]   ;;  %v151_v1 = vrot.slane %v135_v42, %v127_v40  ;;  %vm582_vm0 = vcmask 25600  }
  0x26   :  { %v766_v56 = vld [vmem:[%s991_s1 + $0x118] sm:$0xff]   ;;  %v767_v57 = vld [vmem:[%s991_s1 + $0x160] sm:$0xff]   ;;  %v769_v59 = vld [vmem:[%s991_s1 + $0x168] sm:$0xff]  }
  0x27   :  { %705 = vmatpush3.bf16.msra.mxu0 %v762_v52  ;;  %v768_v58 = vld [vmem:[%s991_s1 + $0x120] sm:$0xff]   ;;  %v770_v60 = vld [vmem:[%s991_s1 + $0x128] sm:$0xff]   ;;  %v771_v61 = vld [vmem:[%s991_s1 + $0x170] sm:$0xff]  }
  0x28   :  { %706 = vmatprep.subr.bf16.mxu0 %v763_v53  ;;  %v772_v62 = vld [vmem:[%s991_s1 + $0x130] sm:$0xff]   ;;  %v773_v63 = vld [vmem:[%s991_s1 + $0x178] sm:$0xff]   ;;  %v609_v3 = vld [vmem:[%s992_s2] ss:$0 sm:$0xff] }
  0x29   :  { %v774_v0 = vld [vmem:[%s991_s1 + $0x138] sm:$0xff]   ;;  %s804_s1 = smov [#allocation2]  }
  0x2a   :  { %s601_s2 = sshll.u32 %s804_s1, 4  ;;  %s602_s2 = int_to_ptr.vmem [resolvable:$true] %s601_s2 }
  0x2b   :  { %707 = vmatpush3.bf16.msra.mxu0 %v764_v54  ;;  %s779_s29 = scalar_lea.vmem %s602_s2, 32  ;;  %p784_p1 = scmp.lt.s32.totalorder %s602_s2, %s602_s2 }
  0x2c   :  { %708 = vmatprep.subr.bf16.mxu0 %v765_v55  ;;  %p780_p0 = scmp.ne.s32.totalorder %s602_s2, %s779_s29  ;;  %p785_p2 = scmp.lt.s32.totalorder %s779_s29, %s779_s29 }
  0x2e   :  { %p786_p3 = por %p785_p2, %p784_p1 }
  0x2f   :  { %709 = vmatpush3.bf16.msra.mxu0 %v766_v56 }
  0x30   :  { %710 = vmatprep.subr.bf16.mxu0 %v767_v57  ;;  %p787_p4 = pnand %p786_p3, %p780_p0 }
  0x33   :  { %711 = vmatpush3.bf16.msra.mxu0 %v768_v58 }
  0x34   :  { %712 = vmatprep.subr.bf16.mxu0 %v769_v59 }
  0x37   :  { %713 = vmatpush3.bf16.msra.mxu0 %v770_v60 }
  0x38   :  { %714 = vmatprep.subr.bf16.mxu0 %v771_v61 }
  0x3b   :  { %715 = vmatpush3.bf16.msra.mxu0 %v772_v62 }
  0x3c   :  { %716 = vmatprep.subr.bf16.mxu0 %v773_v63 }
  0x3f   :  { %717 = vmatpush3.bf16.msra.mxu0 %v774_v0 }
  0x42   :  { %575 = vmatmul.mubr.bf16.vlgmr.msra.gmra.mrb[4].mxu0 %v151_v1 }
  0xf5   :  { %v674_v2 = vpop.f32.mrb[0].mxu0 }
  0xf6   :  { %v675_v4 = vpop.f32.mrb[1].mxu0 }
  0xf7   :  { %v676_v5 = vadd.f32 %v675_v4, %v674_v2  ;;  %v677_v6 = vpop.f32.mrb[2].mxu0  ;;  %v696_v7 = vpop.f32.mrb[0].mxu1 }
  0xf8   :  { %v678_v8 = vpop.f32.mrb[3].mxu0  ;;  %v697_v9 = vpop.f32.mrb[1].mxu1 }
  0xf9   :  { %v497_v10 = vadd.f32 %v676_v5, %v609_v3  ;;  %v698_v11 = vadd.f32 %v697_v9, %v696_v7  ;;  %v699_v12 = vpop.f32.mrb[2].mxu1 }
  0xfa   :  { %v700_v13 = vpop.f32.mrb[3].mxu1 }
  0xfb   :  { %v537_v14 = vadd.f32 %v698_v11, %v497_v10 }
 0x115   :  { %v718_v15 = vpop.f32.mrb[4].mxu0 }
 0x116   :  { %v719_v16 = vpop.f32.mrb[5].mxu0 }
 0x117   :  { %v720_v17 = vadd.f32 %v719_v16, %v718_v15  ;;  %v721_v18 = vpop.f32.mrb[6].mxu0 }
 0x118   :  { %v722_v19 = vpop.f32.mrb[7].mxu0 }
 0x119   :  { %v577_v20 = vadd.f32 %v720_v17, %v537_v14 }
 0x11b   :  { %v583_v21 = vsel %vm582_vm0, %v577_v20, -inf }
 0x11c   :  { %584 = vmax.xlane.f32.xlu0 %v583_v21 }
 0x1a9   :  { %v585_v22 = vpop.xlane.xlu0 %584 }
 0x1aa   :  { %v586_v23 = vsub.f32 %v577_v20, %v585_v22 }
 0x1ac   :  { %v587_v24 = vmul.f32 1.442695, %v586_v23 }
 0x1ae   :  { %775 = vpow2.f32 %v587_v24 }
 0x1b8   :  { %v776_v25 = vpop.eup %775 }
 0x1b9   :  { %v589_v26 = vsel %vm582_vm0, %v776_v25, 0.0 }
 0x1ba   :  { %590 = vadd.xlane.f32.xlu0 %v589_v26 }
 0x247   :  { %v591_v27 = vpop.xlane.xlu0 %590 }
 0x248   :  { %777 = vrcp.f32 %v591_v27 }
 0x252   :  { %v778_v28 = vpop.eup %777 }
 0x253   :  { %v593_v29 = vmul.f32 %v778_v28, %v776_v25 }
 0x255   :  { %594 = vst.msk [vmem:[#allocation2] sm:$0x3] %vm582_vm0, %v593_v29 }
 0x256   :  { %790 = shalt.err (!%p787_p4)
}
 0x257   :  { %s791_s5 = scalar_lea.hbm %s993_s3, 32 }
 0x258   :  { %p792_p5 = scmp.ne.s32.totalorder %s993_s3, %s791_s5  ;;  %p795_p6 = scmp.lt.u32.totalorder %s791_s5, %s993_s3 }
 0x25a   :  { %p797_p7 = pnand %p795_p6, %p792_p5 }
 0x25c   :  { %800 = shalt.err (!%p797_p7)
}
 0x25d   :  { %604 = dma.vmem_to_hbm [thread:$0]  %s602_s2, 32, %s993_s3, [#allocation3]  }
 0x25e   :  { %801 = dma.done.wait [#allocation3], 32  }
 0x25f   :  { %802 = vsyncadd [#allocation3], 4294967264 }
 0x260   :  { %608 = vsyncpa [#allocation3], 1 }

</bundles_post_ra>
